<compile_context>
chip_gen: v6e
topology: v6e:2x2x1
jax: 0.10.0
libtpu: 0.0.40
codegen_flags: <defaults>
</compile_context>

<pallas_src>
import math

import jax
import jax.numpy as jnp
from jax.experimental import pallas as pl
from jax.experimental.pallas import tpu as pltpu


_ROW_ALIGN = 16                       # bf16 sublane packing for the x operand
_DEFAULT_OUT_BLOCK_BYTES = 4 * 1024 * 1024


def _round_up(n: int, m: int) -> int:
    return ((n + m - 1) // m) * m


def _kernel(x_ref, s_ref, f_ref, p_ref, o_ref):
    # MXU: expand packed timesteps across their dim-wide lane groups.
    #   x_ref: (T, K) bf16 -- 3 bf16-exact parts per timestep (bf16_3x split)
    #   s_ref: (K, W) bf16 -- {0,1} selection matrix (part column -> lane group)
    # bf16 x bf16 with f32 accumulation reconstructs x to <= 1 ulp.
    x_exp = jnp.dot(x_ref[...], s_ref[...], preferred_element_type=jnp.float32)
    # VALU: one multiply (per-lane frequency) + one add (0 / pi/2 phase),
    # then a single transcendental pass; cos(z) == sin(z + pi/2).
    o_ref[...] = jnp.sin(x_exp * f_ref[...] + p_ref[...])


def sinusoidal_pos_emb(x: jax.Array, dim: int, *,
                       out_block_bytes: int = _DEFAULT_OUT_BLOCK_BYTES) -> jax.Array:
    """x: (B,) timesteps -> (B, dim) float32 sinusoidal embeddings."""
    assert x.ndim == 1, "expected a 1-D vector of positions/timesteps"
    assert dim % 2 == 0, "dim must be even (sin/cos halves)"
    assert dim >= 4, "dim >= 4 required (dim == 2 divides by zero, as in PyTorch)"

    b = x.shape[0]
    half = dim // 2
    scale = math.log(10000.0) / (half - 1)

    # ---- trace-time tables (nothing rebuilt inside the kernel) --------------
    freqs = jnp.exp(jnp.arange(half, dtype=jnp.float32) * jnp.float32(-scale))  # (half,)
    f_dup = jnp.concatenate([freqs, freqs])                                     # (dim,)
    p_dup = jnp.concatenate([jnp.zeros((half,), jnp.float32),
                             jnp.full((half,), math.pi / 2.0, jnp.float32)])    # (dim,)

    # ---- lane-dense output layout -------------------------------------------
    if dim >= 128:
        groups, width = 1, _round_up(dim, 128)       # pad lanes to x128, slice after
    elif 128 % dim == 0:
        groups, width = 128 // dim, 128              # pack G timesteps per 128-lane row
    else:
        # rare (even dim < 128 that does not divide 128): narrow masked stores
        groups, width = 1, dim

    pad_lanes = width - groups * dim
    f_lane = jnp.tile(f_dup, groups)
    p_lane = jnp.tile(p_dup, groups)
    if pad_lanes:
        zeros = jnp.zeros((pad_lanes,), jnp.float32)
        f_lane = jnp.concatenate([f_lane, zeros])
        p_lane = jnp.concatenate([p_lane, zeros])
    f_tbl = f_lane[None, :]                          # (1, width) f32
    p_tbl = p_lane[None, :]                          # (1, width) f32

    # {0,1} selection matrix: column (3g + part) feeds the lanes of group g.
    k_dim = 3 * groups
    k_pad = _round_up(k_dim, _ROW_ALIGN)
    lane_group = jnp.arange(width) // dim                           # (width,)
    col_group = jnp.arange(k_dim) // 3                              # (k_dim,)
    s_tbl = (lane_group[None, :] == col_group[:, None]).astype(jnp.bfloat16)
    if k_pad != k_dim:
        s_tbl = jnp.concatenate(
            [s_tbl, jnp.zeros((k_pad - k_dim, width), jnp.bfloat16)], axis=0)

    # ---- pack x: pad B to a multiple of G, bf16_3x split for exact MXU path --
    b_pad = _round_up(b, groups)
    x32 = x.astype(jnp.float32)
    if b_pad != b:
        x32 = jnp.concatenate([x32, jnp.zeros((b_pad - b,), jnp.float32)])
    rows = b_pad // groups
    xg = x32.reshape(rows, groups)
    part0 = xg.astype(jnp.bfloat16)
    rem1 = xg - part0.astype(jnp.float32)
    part1 = rem1.astype(jnp.bfloat16)
    rem2 = rem1 - part1.astype(jnp.float32)
    part2 = rem2.astype(jnp.bfloat16)                # residual <= |x| * 2^-26
    x_aug = jnp.stack([part0, part1, part2], axis=-1).reshape(rows, k_dim)
    if k_pad != k_dim:
        x_aug = jnp.concatenate(
            [x_aug, jnp.zeros((rows, k_pad - k_dim), jnp.bfloat16)], axis=1)

    # ---- row tiling: big (>= multi-MB) blocks, >= 2 steps when it matters ----
    row_bytes = 4 * width
    if rows < 2 * _ROW_ALIGN:
        tile_rows = rows                              # single full block
    else:
        tile_rows = max(_ROW_ALIGN,
                        (out_block_bytes // row_bytes) // _ROW_ALIGN * _ROW_ALIGN)
        # >= 2 grid steps so dimension_semantics=("parallel",) can use both
        # v7x TensorCores (free on v5e/v6e).
        half_rows = _round_up(pl.cdiv(rows, 2), _ROW_ALIGN)
        tile_rows = min(tile_rows, half_rows)
    grid = (pl.cdiv(rows, tile_rows),)

    n_out = rows * width
    cost = pl.CostEstimate(
        flops=2 * rows * k_pad * width + 2 * n_out,
        transcendentals=n_out,
        bytes_accessed=4 * n_out + 2 * rows * k_pad + 2 * k_pad * width + 8 * width,
    )

    out = pl.pallas_call(
        _kernel,
        out_shape=jax.ShapeDtypeStruct((rows, width), jnp.float32),
        grid=grid,
        in_specs=[
            pl.BlockSpec((tile_rows, k_pad), lambda i: (i, 0)),   # packed x parts
            pl.BlockSpec((k_pad, width), lambda i: (0, 0)),       # selection matrix
            pl.BlockSpec((1, width), lambda i: (0, 0)),           # frequency row
            pl.BlockSpec((1, width), lambda i: (0, 0)),           # phase row
        ],
        out_specs=pl.BlockSpec((tile_rows, width), lambda i: (i, 0)),
        compiler_params=pltpu.CompilerParams(
            dimension_semantics=("parallel",),
            vmem_limit_bytes=32 * 1024 * 1024,        # explicit: > v5e's 16 MiB default
        ),
        cost_estimate=cost,
    )(x_aug, s_tbl, f_tbl, p_tbl)

    # ---- undo the lane-dense packing (free reshape / cheap slice) ------------
    if groups > 1:
        out = out.reshape(b_pad, dim)                 # row-major: byte-identical
        if b_pad != b:
            out = out[:b]
    elif width != dim:
        out = out[:, :dim]
    return out


def _reference(x: jax.Array, dim: int) -> jax.Array:
    half = dim // 2
    emb = math.log(10000.0) / (half - 1)
    emb = jnp.exp(jnp.arange(half, dtype=jnp.float32) * -emb)
    emb = x.astype(jnp.float32)[:, None] * emb[None, :]
    return jnp.concatenate([jnp.sin(emb), jnp.cos(emb)], axis=-1)


if __name__ == "__main__":
    key = jax.random.PRNGKey(0)
    k0, k1, k2, k3 = jax.random.split(key, 4)

    # 1) Small shape consistent with the module: a batch of diffusion timesteps.
    B, DIM = 8, 32
    x = jax.random.uniform(k0, (B,), jnp.float32, minval=0.0, maxval=100.0)
    out = jax.block_until_ready(sinusoidal_pos_emb(x, DIM))
    ref = _reference(x, DIM)
    assert out.shape == (B, DIM), out.shape
    assert jnp.allclose(out, ref, atol=1e-4, rtol=1e-5), "mismatch (packed path)"

    # 2) Multi-step parallel grid, dim a multiple of 128 (no packing needed).
    B2, DIM2 = 32768, 128
    x2 = jax.random.uniform(k1, (B2,), jnp.float32, minval=0.0, maxval=100.0)
    out2 = jax.block_until_ready(sinusoidal_pos_emb(x2, DIM2))
    ref2 = _reference(x2, DIM2)
    assert out2.shape == (B2, DIM2)
    assert jnp.allclose(out2, ref2, atol=1e-4, rtol=1e-5), "mismatch (grid path)"

    # 3) Batch not a multiple of the packing factor (B padded then sliced).
    B3, DIM3 = 10, 32
    x3 = jax.random.uniform(k2, (B3,), jnp.float32, minval=0.0, maxval=100.0)
    out3 = jax.block_until_ready(sinusoidal_pos_emb(x3, DIM3))
    ref3 = _reference(x3, DIM3)
    assert out3.shape == (B3, DIM3)
    assert jnp.allclose(out3, ref3, atol=1e-4, rtol=1e-5), "mismatch (B-pad path)"

    # 4) dim >= 128 but not a multiple of 128 (lane axis padded then sliced).
    B4, DIM4 = 16, 192
    x4 = jax.random.uniform(k3, (B4,), jnp.float32, minval=0.0, maxval=100.0)
    out4 = jax.block_until_ready(sinusoidal_pos_emb(x4, DIM4))
    ref4 = _reference(x4, DIM4)
    assert out4.shape == (B4, DIM4)
    assert jnp.allclose(out4, ref4, atol=1e-4, rtol=1e-5), "mismatch (width-pad path)"

    print("KERNEL_OK")
</pallas_src>

<mosaic_0001>
module attributes {stable_mosaic.version = 11 : i64} {
  func.func @_kernel(%arg0: i32, %arg1: memref<2x16xbf16, #tpu.memory_space<vmem>>, %arg2: memref<16x128xbf16, #tpu.memory_space<vmem>>, %arg3: memref<1x128xf32, #tpu.memory_space<vmem>>, %arg4: memref<1x128xf32, #tpu.memory_space<vmem>>, %arg5: memref<2x128xf32, #tpu.memory_space<vmem>>) attributes {dimension_semantics = [#tpu.dimension_semantics<parallel>], iteration_bounds = array<i64: 1>, scalar_prefetch = 0 : i64, scratch_operands = 0 : i64, tpu.core_type = #tpu.core_type<tc>, window_params = [{transform_indices = @transform_0, window_bounds = array<i64: 2, 16>}, {pipeline_mode = #tpu.pipeline_mode<synchronous>, transform_indices = @transform_1, window_bounds = array<i64: 16, 128>}, {pipeline_mode = #tpu.pipeline_mode<synchronous>, transform_indices = @transform_2, window_bounds = array<i64: 1, 128>}, {pipeline_mode = #tpu.pipeline_mode<synchronous>, transform_indices = @transform_3, window_bounds = array<i64: 1, 128>}, {transform_indices = @transform_4, window_bounds = array<i64: 2, 128>}]} {
    %c0 = arith.constant 0 : index
    %c0_0 = arith.constant 0 : index
    %0 = vector.load %arg1[%c0, %c0_0] : memref<2x16xbf16, #tpu.memory_space<vmem>>, vector<2x16xbf16>
    %c0_1 = arith.constant 0 : index
    %c0_2 = arith.constant 0 : index
    %1 = vector.load %arg2[%c0_1, %c0_2] : memref<16x128xbf16, #tpu.memory_space<vmem>>, vector<16x128xbf16>
    %cst = arith.constant dense<0.000000e+00> : vector<2x128xf32>
    %2 = tpu.matmul %0, %1, %cst {dimension_numbers = #tpu.dot_dimension_numbers<[1], [0], [0], [1], [0, 0, 1, 1], [], []>} : vector<2x16xbf16>, vector<16x128xbf16>, vector<2x128xf32> -> vector<2x128xf32>
    %c0_3 = arith.constant 0 : index
    %c0_4 = arith.constant 0 : index
    %3 = vector.load %arg3[%c0_3, %c0_4] : memref<1x128xf32, #tpu.memory_space<vmem>>, vector<1x128xf32>
    %4 = vector.broadcast %3 : vector<1x128xf32> to vector<2x128xf32>
    %5 = arith.mulf %2, %4 : vector<2x128xf32>
    %c0_5 = arith.constant 0 : index
    %c0_6 = arith.constant 0 : index
    %6 = vector.load %arg4[%c0_5, %c0_6] : memref<1x128xf32, #tpu.memory_space<vmem>>, vector<1x128xf32>
    %7 = vector.broadcast %6 : vector<1x128xf32> to vector<2x128xf32>
    %8 = arith.addf %5, %7 : vector<2x128xf32>
    %9 = math.sin %8 : vector<2x128xf32>
    %c0_7 = arith.constant 0 : index
    %c0_8 = arith.constant 0 : index
    %10 = vector.load %arg5[%c0_7, %c0_8] : memref<2x128xf32, #tpu.memory_space<vmem>>, vector<2x128xf32>
    tpu.vector_store %arg5[%c0_7, %c0_8], %9 {strides = array<i32>} : memref<2x128xf32, #tpu.memory_space<vmem>>, vector<2x128xf32>,
    return
  }
  func.func @transform_0(%arg0: i32) -> (i32, i32) {
    %c0_i32 = arith.constant 0 : i32
    %c0_i32_0 = arith.constant 0 : i32
    return %arg0, %c0_i32 : i32, i32
  }
  func.func @transform_1(%arg0: i32) -> (i32, i32) {
    %c0_i32 = arith.constant 0 : i32
    %c0_i32_0 = arith.constant 0 : i32
    %c0_i32_1 = arith.constant 0 : i32
    return %c0_i32, %c0_i32_0 : i32, i32
  }
  func.func @transform_2(%arg0: i32) -> (i32, i32) {
    %c0_i32 = arith.constant 0 : i32
    %c0_i32_0 = arith.constant 0 : i32
    %c0_i32_1 = arith.constant 0 : i32
    return %c0_i32, %c0_i32_0 : i32, i32
  }
  func.func @transform_3(%arg0: i32) -> (i32, i32) {
    %c0_i32 = arith.constant 0 : i32
    %c0_i32_0 = arith.constant 0 : i32
    %c0_i32_1 = arith.constant 0 : i32
    return %c0_i32, %c0_i32_0 : i32, i32
  }
  func.func @transform_4(%arg0: i32) -> (i32, i32) {
    %c0_i32 = arith.constant 0 : i32
    %c0_i32_0 = arith.constant 0 : i32
    return %arg0, %c0_i32 : i32, i32
  }
}

</mosaic_0001>

<bundles_post_ra>
// kernel: tpu_custom_call.1
= control target key start
LH: loop header
LB: loop body
LE: loop exit
PB: predicated region body
PF: predicated region fallthrough
CT: control target
= control target key end

     0   :  { %9 = vsyncpa [#allocation3], 0  ;;  %s413_s0 = inlined_call_operand.hbm [shape: bf16[2,16], index: 0, kind: input, shape index: {}]   ;;  %s414_s1 = inlined_call_operand.hbm [shape: bf16[16,128], index: 1, kind: input, shape index: {}]   ;;  %s415_s2 = inlined_call_operand.vmem [shape: f32[1,128], index: 2, kind: input, shape index: {}]   ;;  %s416_s3 = inlined_call_operand.vmem [shape: f32[1,128], index: 3, kind: input, shape index: {}]   ;;  %s417_s4 = inlined_call_operand.hbm [shape: f32[2,128], index: 4, kind: output, shape index: {}]  }
   0x1   :  { %10 = vsyncpa [#allocation6], 0 }
   0x2   :  { %11 = vsyncpa [#allocation4], 0  ;;  %s339_s15 = smov [#allocation2]   ;;  %s340_s17 = smov [#allocation5]  }
   0x3   :  { %s18_s16 = sshll.u32 %s339_s15, 4  ;;  %s27_s18 = sshll.u32 %s340_s17, 4  ;;  %s19_s16 = int_to_ptr.vmem [resolvable:$true] %s18_s16  ;;  %s28_s18 = int_to_ptr.vmem [resolvable:$true] %s27_s18 }
   0x4   :  { %s281_s19 = scalar_lea.vmem %s19_s16, 16  ;;  %s285_s20 = scalar_lea.vmem %s19_s16, 32 }
   0x5   :  { %p282_p0 = scmp.ne.s32.totalorder %s19_s16, %s281_s19  ;;  %p286_p1 = scmp.lt.s32.totalorder %s19_s16, %s19_s16 }
   0x6   :  { %p287_p2 = scmp.lt.s32.totalorder %s285_s20, %s281_s19 }
   0x8   :  { %p288_p3 = por %p287_p2, %p286_p1 }
   0xa   :  { %p289_p4 = pnand %p288_p3, %p282_p0 }
   0xc   :  { %292 = shalt.err (!%p289_p4)
}
   0xd   :  { %21 = dma.hbm_to_vmem [thread:$0]  %s413_s0, 16, %s19_s16, [#allocation3]  }
   0xe   :  { %s301_s23 = scalar_lea.vmem %s28_s18, 128  ;;  %p306_p6 = scmp.lt.s32.totalorder %s28_s18, %s28_s18 }
   0xf   :  { %p302_p5 = scmp.ne.s32.totalorder %s28_s18, %s301_s23  ;;  %p307_p7 = scmp.lt.s32.totalorder %s301_s23, %s301_s23 }
  0x11   :  { %p308_p8 = por %p307_p7, %p306_p6 }
  0x13   :  { %p309_p9 = pnand %p308_p8, %p302_p5 }
  0x15   :  { %312 = shalt.err (!%p309_p9)
}
  0x16   :  { %s341_s24 = smov 64   ;;  %s342_s25 = smov 4  }
  0x17   :  { %33 = dma.hbm_to_vmem [thread:$0]  %s414_s1, 128, %s28_s18, [#allocation6], %s341_s24, %s341_s24, %s342_s25  }
  0x18   :  { %333 = dma.done.wait [#allocation3], 16  }
  0x19   :  { %334 = vsyncadd [#allocation3], 4294967280 }
  0x1a   :  { %335 = dma.done.wait [#allocation6], 128  }
  0x1b   :  { %336 = vsyncadd [#allocation6], 4294967168  ;;  %v343_v0 = vmov 0.0   ;;  %vm344_vm0 = vmmov 0   ;;  %v268_v1 = vld [vmem:[#allocation5] sm:$0xff]   ;;  %vm54_vm1 = vcmask 130048  }
  0x1c   :  { %245 = vmatprep.subr.bf16.mxu0 %v343_v0  ;;  %247 = vmatprep.mubr.msk.bf16.mxu0 %vm344_vm0, %v343_v0  ;;  %v45_v2 = vld [vmem:[#allocation2] sm:$0x1]  ;;  %v345_v22 = vmov 2102212464   ;;  %v346_v24 = vmov 920167782  }
  0x1d   :  { %246 = vmatpush3.bf16.msra.mxu0 %v268_v1  ;;  %v237_v3 = vld [vmem:[%s415_s2] ss:$0 sm:$0xff]  ;;  %v347_v28 = vmov 1326507024   ;;  %v348_v30 = vmov 683565275  }
  0x1e   :  { %v238_v5 = vld [vmem:[%s416_s3] ss:$0 sm:$0xff]  ;;  %v349_v32 = vmov 2475754826   ;;  %v350_v35 = vmov 2131351028  }
  0x1f   :  { %s351_s2 = smov [#allocation7]  }
  0x20   :  { %248 = vmatmul.mubr.msk.bf16.vlgmr.msra.gmra.mxu0 %vm54_vm1, %v45_v2  ;;  %s225_s3 = sshll.u32 %s351_s2, 4  ;;  %s226_s3 = int_to_ptr.vmem [resolvable:$true] %s225_s3 }
  0x21   :  { %s313_s30 = scalar_lea.vmem %s226_s3, 32  ;;  %p318_p11 = scmp.lt.s32.totalorder %s226_s3, %s226_s3 }
  0x22   :  { %p314_p10 = scmp.ne.s32.totalorder %s226_s3, %s313_s30  ;;  %p319_p12 = scmp.lt.s32.totalorder %s313_s30, %s313_s30 }
  0x24   :  { %p320_p13 = por %p319_p12, %p318_p11 }
  0x26   :  { %p321_p0 = pnand %p320_p13, %p314_p10 }
  0xe0   :  { %v92_v4 = vpop.f32.mrf.mxu0 }
  0xe1   :  { %v105_v6 = vmul.f32 %v237_v3, %v92_v4 }
  0xe2   :  { %v249_v7 = vpop.f32.mrf.mxu0 }
  0xe3   :  { %v389_v8 = vadd.f32 %v238_v5, %v105_v6 }
  0xe4   :  { %v95_v9 = vpop.f32.mrf.mxu0 }
  0xe5   :  { %v117_v10 = vand.u32 2139095040, %v389_v8  ;;  %v114_v12 = vand.u32 2147483647, %v389_v8  ;;  %vm116_vm9 = vcmp.lt.s32.totalorder %v389_v8, 0  ;;  %vm206_vm14 = vweird.f32 %v389_v8 }
  0xe6   :  { %v250_v11 = vpop.f32.mrf.mxu0 }
  0xe7   :  { %v118_v13 = vshrl.u32 %v117_v10, 23  ;;  %v121_v15 = vand.u32 8388607, %v114_v12  ;;  %vm115_vm10 = vcmp.le.f32.partialorder %v114_v12, 0.7853982 }
  0xe9   :  { %v239_v14 = vadd.s32 4294967169, %v118_v13  ;;  %v122_v18 = vor.u32 8388608, %v121_v15 }
  0xeb   :  { %v124_v16 = vadd.s32 1, %v239_v14  ;;  %v162_v26 = vshll.u32 %v122_v18, 8 }
  0xed   :  { %vm125_vm2 = vcmp.gt.s32.totalorder %v124_v16, 0 }
  0xee   :  { %v126_v17 = vsel %vm125_vm2, %v124_v16, 0 }
  0xef   :  { %v128_v19 = vand.u32 31, %v126_v17  ;;  %v127_v20 = vshrl.u32 %v126_v17, 5 }
  0xf1   :  { %v129_v21 = vsub.s32 32, %v128_v19  ;;  %v140_v23 = vshll.u32 %v345_v22, %v128_v19  ;;  %v143_v25 = vshll.u32 %v346_v24, %v128_v19  ;;  %v131_v31 = vshll.u32 %v348_v30, %v128_v19 }
  0xf2   :  { %v134_v34 = vshll.u32 %v349_v32, %v128_v19  ;;  %v137_v37 = vshll.u32 %v350_v35, %v128_v19  ;;  %vm149_vm3 = vcmp.lt.s32.totalorder %v127_v20, 4  ;;  %vm146_vm4 = vcmp.lt.s32.totalorder %v127_v20, 1 }
  0xf3   :  { %v141_v27 = vshrl.u32 %v346_v24, %v129_v21  ;;  %v144_v29 = vshrl.u32 %v347_v28, %v129_v21  ;;  %v132_v33 = vshrl.u32 %v349_v32, %v129_v21  ;;  %v135_v36 = vshrl.u32 %v350_v35, %v129_v21 }
  0xf4   :  { %v138_v38 = vshrl.u32 %v345_v22, %v129_v21  ;;  %v130_v42 = vshrl.u32 %v348_v30, %v129_v21  ;;  %vm147_vm5 = vcmp.lt.s32.totalorder %v127_v20, 2  ;;  %vm148_vm6 = vcmp.lt.s32.totalorder %v127_v20, 3 }
  0xf5   :  { %v142_v39 = vor.u32 %v141_v27, %v140_v23  ;;  %v145_v40 = vor.u32 %v144_v29, %v143_v25  ;;  %v133_v41 = vor.u32 %v132_v33, %v131_v31  ;;  %v136_v43 = vor.u32 %v135_v36, %v134_v34 }
  0xf6   :  { %v139_v44 = vor.u32 %v138_v38, %v137_v37 }
  0xf7   :  { %v155_v45 = vsel %vm149_vm3, %v142_v39, 920167782  ;;  %v159_v46 = vsel %vm149_vm3, %v145_v40, 1326507024  ;;  %v154_v48 = vsel %vm146_vm4, %v133_v41, %v136_v43  ;;  %v150_v51 = vsel %vm146_vm4, %v130_v42, %v133_v41 }
  0xf8   :  { %v151_v47 = vsel %vm149_vm3, %v139_v44, 2102212464  ;;  %v156_v49 = vsel %vm148_vm6, %v139_v44, %v155_v45  ;;  %v158_v50 = vsel %vm146_vm4, %v136_v43, %v139_v44  ;;  %v160_v54 = vsel %vm148_vm6, %v142_v39, %v159_v46 }
  0xf9   :  { %v152_v52 = vsel %vm148_vm6, %v136_v43, %v151_v47  ;;  %v157_v53 = vsel %vm147_vm5, %v154_v48, %v156_v49  ;;  %v161_v55 = vsel %vm147_vm5, %v158_v50, %v160_v54 }
  0xfa   :  { %v395_v56 = vmul.u32.u64.low %v162_v26, %v157_v53  ;;  %v396_v57 = vmul.u32.u64.high %v162_v26, %v157_v53, %v395_v56  ;;  %v398_v58 = vmul.u32.u64.low %v162_v26, %v161_v55  ;;  %v399_v59 = vmul.u32.u64.high %v162_v26, %v161_v55, %v398_v58 }
  0xfb   :  { %v153_v60 = vsel %vm147_vm5, %v150_v51, %v152_v52 }
  0xfc   :  { %v172_v61 = vadd.s32 1, %v396_v57  ;;  %v169_v62 = vmul.u32 %v162_v26, %v153_v60  ;;  %vm171_vm7 = vc.u32 %v399_v59, %v395_v56  ;;  %v170_v11 = vadd.s32 %v395_v56, %v399_v59 }
  0xfe   :  { %v173_v63 = vsel %vm171_vm7, %v172_v61, %v396_v57 }
  0xff   :  { %v174_v0 = vadd.s32 %v173_v63, %v169_v62 }
 0x101   :  { %v175_v1 = vadd.s32 536870912, %v174_v0 }
 0x103   :  { %v176_v2 = vshrl.u32 %v175_v1, 30 }
 0x105   :  { %v177_v3 = vshll.u32 %v176_v2, 30  ;;  %v200_v25 = vsub.s32 4, %v176_v2 }
 0x107   :  { %v178_v4 = vsub.s32 %v174_v0, %v177_v3  ;;  %v201_v28 = vsel %vm116_vm9, %v200_v25, %v176_v2 }
 0x108   :  { %v203_v29 = vsel %vm115_vm10, 0, %v201_v28 }
 0x109   :  { %v180_v5 = vsub.s32 0, %v178_v4  ;;  %v207_v30 = vadd.s32 3, %v203_v29 }
 0x10b   :  { %v240_v6 = vmin.u32 %v180_v5, %v178_v4  ;;  %v208_v31 = vand.u32 3, %v207_v30 }
 0x10d   :  { %v182_v7 = vclz %v240_v6  ;;  %vm213_vm11 = vcmp.eq.s32.totalorder %v208_v31, 2  ;;  %vm210_vm12 = vcmp.eq.s32.totalorder %v208_v31, 0  ;;  %vm209_vm13 = vcmp.lt.s32.totalorder %v208_v31, 2 }
 0x10f   :  { %v241_v9 = vadd.s32 4294967294, %v182_v7 }
 0x111   :  { %vm242_vm8 = vcmp.lt.s32.totalorder %v241_v9, 0 }
 0x112   :  { %v185_v10 = vsel %vm242_vm8, 0, %v241_v9 }
 0x113   :  { %v186_v13 = vsub.s32 32, %v185_v10  ;;  %v190_v14 = vsub.s32 4294967266, %v185_v10  ;;  %v187_v15 = vshll.u32 %v178_v4, %v185_v10 }
 0x115   :  { %v188_v16 = vshrl.u32 %v170_v11, %v186_v13  ;;  %v191_v17 = vadd.s32 127, %v190_v14 }
 0x117   :  { %v189_v18 = vor.u32 %v188_v16, %v187_v15  ;;  %v192_v19 = vshll.u32 %v191_v17, 23 }
 0x119   :  { %v193_v20 = vor.u32 4788187, %v192_v19  ;;  %v196_v22 = vcvt.s32.f32 %v189_v18 }
 0x11b   :  { %v194_v21 = vand.u32 2147483647, %v193_v20 }
 0x11d   :  { %v197_v23 = vmul.f32 %v196_v22, %v194_v21 }
 0x11f   :  { %v198_v24 = vxor.u32 2147483648, %v197_v23 }
 0x121   :  { %v199_v26 = vsel %vm116_vm9, %v198_v24, %v197_v23 }
 0x122   :  { %v202_v27 = vsel %vm115_vm10, %v389_v8, %v199_v26 }
 0x123   :  { %269 = vcosq.f32 %v202_v27 }
 0x124   :  { %271 = vsinq.f32 %v202_v27 }
 0x130   :  { %v270_v32 = vpop.eup %269 }
 0x131   :  { %v272_v33 = vpop.eup %271  ;;  %v214_v34 = vxor.u32 2147483648, %v270_v32 }
 0x132   :  { %v211_v35 = vxor.u32 2147483648, %v272_v33 }
 0x133   :  { %v215_v36 = vsel %vm213_vm11, %v214_v34, %v272_v33 }
 0x134   :  { %v212_v12 = vsel %vm210_vm12, %v270_v32, %v211_v35 }
 0x135   :  { %v216_v37 = vsel %vm209_vm13, %v212_v12, %v215_v36 }
 0x136   :  { %v217_v38 = vsel %vm206_vm14, nan, %v216_v37 }
 0x137   :  { %218 = vst [vmem:[#allocation7] sm:$0x3] %v217_v38 }
 0x138   :  { %324 = shalt.err (!%p321_p0)
}
 0x139   :  { %228 = dma.vmem_to_hbm [thread:$0]  %s226_s3, 32, %s417_s4, [#allocation4]  }
 0x13a   :  { %337 = dma.done.wait [#allocation4], 32  }
 0x13b   :  { %338 = vsyncadd [#allocation4], 4294967264 }
 0x13c   :  { %232 = vsyncpa [#allocation3], 1 }
 0x13d   :  { %233 = vsyncpa [#allocation6], 1 }
 0x13e   :  { %234 = vsyncpa [#allocation4], 1 }

</bundles_post_ra>
